<compile_context>
chip_gen: v7x
topology: tpu7x:2x2x1
jax: 0.10.0
libtpu: 0.0.40
codegen_flags: <defaults>
</compile_context>

<pallas_src>
import functools
import math

import jax
import jax.numpy as jnp
from jax import lax
from jax.experimental import pallas as pl
from jax.experimental.pallas import tpu as pltpu


def _temperature(step: int, weight_calm_time: int) -> float:
    """Mirrors TemperedCriterion.temperature (host-side, static)."""
    if weight_calm_time < 1:
        return 1.0
    t, c = step, weight_calm_time
    return math.exp(-((1.0 - math.log(c) / c) ** (t - c)))


def _round_down(x, m):
    return (x // m) * m


def _pick_tile_n(n_rows, vocab, itemsize, *, cap=1024, vmem_budget_bytes=6 << 20):
    """Largest row tile that keeps one (tile_n, V) input buffer under the budget."""
    sub = max(8, 32 // max(itemsize, 1))          # sublane packing: f32->8, bf16->16
    t = min(cap, max(sub, vmem_budget_bytes // max(vocab * itemsize, 1)))
    t = _round_down(t, 64) if t >= 64 else _round_down(t, sub)
    t = max(t, sub)
    if t > n_rows:
        t = n_rows                                 # single full-extent block (always legal)
    return int(t)


def _focal_loss_kernel(x_ref, tgt_ref, sum_ref, *, gamma, pad_idx, n_rows,
                       chunk, tiles_per_split, mask_pad, assume_normalized):
    c = pl.program_id(0)          # row-split axis ("parallel"; megacore on v7x)
    i = pl.program_id(1)          # tiles within a split ("arbitrary"; accumulator axis)

    @pl.when(i == 0)
    def _():
        sum_ref[...] = jnp.zeros_like(sum_ref)

    tile_n, V = x_ref.shape
    row0 = (c * tiles_per_split + i) * tile_n     # global row of this tile's first row

    # Hoisted (re-used by every sub-chunk; avoids re-broadcasting per iteration).
    col = lax.broadcasted_iota(jnp.int32, (chunk, V), 1)
    row_iota = lax.broadcasted_iota(jnp.int32, (chunk, 1), 0)

    acc = jnp.float32(0.0)
    for s in range(tile_n // chunk):              # static sub-chunk loop (<= 16 iters)
        x = x_ref[pl.ds(s * chunk, chunk), :].astype(jnp.float32)   # (chunk, V)
        tgt = tgt_ref[pl.ds(s * chunk, chunk), :]                   # (chunk, 1) int32

        # Gather label log-prob via iota+compare+select (no MXU work needed here).
        label_x = jnp.sum(jnp.where(col == tgt, x, 0.0), axis=1, keepdims=True)

        if assume_normalized:
            # Inputs guaranteed normalized log-probs => logsumexp == 0.
            losses = -label_x
        else:
            # F.cross_entropy re-normalizes: loss = logsumexp(x) - x[target].
            m = jnp.max(x, axis=1, keepdims=True)
            lse = m + jnp.log(jnp.sum(jnp.exp(x - m), axis=1, keepdims=True))
            losses = lse - label_x

        if gamma == 0.0:
            weighted = losses                      # fast path: (1-p)**0 == 1
        else:
            label_p = jnp.exp(label_x)
            base = jnp.maximum(1.0 - label_p, 0.0)  # clamp: avoid NaN from pow
            weighted = losses * jnp.power(base, gamma)

        # Mask ghost rows of a ragged last tile (and pad tokens if mask_pad).
        keep = (row0 + s * chunk + row_iota) < n_rows
        if mask_pad:
            keep = keep & (tgt != pad_idx)
        acc = acc + jnp.sum(jnp.where(keep, weighted, 0.0))

    sum_ref[...] += acc


def focal_loss(inputs, targets, *, gamma=0.0, pad_idx=0, step=0,
               weight_calm_time=0, mask_pad=True, tile_n=None,
               num_row_splits=2, assume_normalized=False):
    """Pallas implementation of FocalLoss.forward (reduction='micro')."""
    N, V = inputs.shape
    assert targets.shape == (N,)
    gamma_eff = float(gamma) * _temperature(step, weight_calm_time)

    itemsize = jnp.dtype(inputs.dtype).itemsize
    if tile_n is None:
        tile_n = _pick_tile_n(N, V, itemsize)
    else:
        assert tile_n > 0 and tile_n % 8 == 0, "tile_n must be a positive multiple of 8"
        tile_n = min(tile_n, max(8, _round_down(N, 8)))

    # Compute sub-chunk (caps vreg pressure for big DMA tiles).
    if tile_n <= 64:
        chunk = tile_n
    elif tile_n % 64 == 0:
        chunk = 64
    else:
        chunk = math.gcd(tile_n, 64)

    num_tiles = pl.cdiv(N, tile_n)
    nsplit = (num_row_splits
              if (num_row_splits > 1 and num_tiles >= num_row_splits
                  and num_tiles % num_row_splits == 0) else 1)
    tps = num_tiles // nsplit

    tgt2d = targets.astype(jnp.int32).reshape(N, 1)   # tiny; inputs are NOT copied/padded

    kernel = functools.partial(
        _focal_loss_kernel, gamma=gamma_eff, pad_idx=pad_idx, n_rows=N,
        chunk=chunk, tiles_per_split=tps, mask_pad=mask_pad,
        assume_normalized=assume_normalized)

    partial_sums = pl.pallas_call(
        kernel,
        out_shape=jax.ShapeDtypeStruct((nsplit, 1, 1), jnp.float32),
        grid=(nsplit, tps),
        in_specs=[pl.BlockSpec((tile_n, V), lambda c, i: (c * tps + i, 0)),
                  pl.BlockSpec((tile_n, 1), lambda c, i: (c * tps + i, 0))],
        out_specs=pl.BlockSpec((1, 1, 1), lambda c, i: (c, 0, 0)),
        compiler_params=pltpu.CompilerParams(
            dimension_semantics=("parallel", "arbitrary"),
            vmem_limit_bytes=32 * 1024 * 1024),
    )(inputs, tgt2d)

    total = jnp.sum(partial_sums)
    if mask_pad:
        cnt = jnp.sum(targets != pad_idx).astype(jnp.float32)
    else:
        cnt = jnp.float32(targets.shape[0])
    # Original module asserts tot_items > 0; guard the all-pad case instead of NaN.
    return jnp.where(cnt > 0, total / jnp.maximum(cnt, 1.0), jnp.float32(0.0))


def _focal_loss_ref(inputs, targets, *, gamma, pad_idx, mask_pad=True):
    """Pure-JAX reference mirroring the PyTorch module."""
    x = inputs.astype(jnp.float32)
    lse = jax.nn.logsumexp(x, axis=1)
    label_x = jnp.take_along_axis(x, targets[:, None].astype(jnp.int32), axis=1)[:, 0]
    losses = lse - label_x
    weights = jnp.power(jnp.maximum(1.0 - jnp.exp(label_x), 0.0), gamma)
    losses = losses * weights
    if mask_pad:
        valid = targets != pad_idx
        losses = jnp.where(valid, losses, 0.0)
        tot = valid.sum()
    else:
        tot = targets.shape[0]
    return losses.sum() / tot


if __name__ == "__main__":
    key = jax.random.PRNGKey(0)
    k1, k2, k3 = jax.random.split(key, 3)

    batch, seq, vocab = 2, 8, 128       # N = batch*seq = 16 rows, V = 128 classes
    N = batch * seq
    pad_idx = 0
    gamma = 2.0

    logits = jax.random.normal(k1, (N, vocab), dtype=jnp.float32)
    log_probs = jax.nn.log_softmax(logits, axis=-1)          # input_type='log_probs'
    targets = jax.random.randint(k2, (N,), 1, vocab, dtype=jnp.int32)
    pad_mask = jax.random.bernoulli(k3, 0.25, (N,))
    targets = jnp.where(pad_mask, pad_idx, targets)

    # 1) f32 inputs, gamma=2 (auto tile).
    out = jax.block_until_ready(focal_loss(log_probs, targets, gamma=gamma, pad_idx=pad_idx))
    ref = _focal_loss_ref(log_probs, targets, gamma=gamma, pad_idx=pad_idx)
    assert jnp.allclose(out, ref, rtol=1e-5, atol=1e-5), (out, ref)

    # 2) gamma=0 trace-time fast path.
    out0 = jax.block_until_ready(focal_loss(log_probs, targets, gamma=0.0, pad_idx=pad_idx))
    ref0 = _focal_loss_ref(log_probs, targets, gamma=0.0, pad_idx=pad_idx)
    assert jnp.allclose(out0, ref0, rtol=1e-5, atol=1e-5), (out0, ref0)

    # 3) Ragged row count (N not a tile multiple) + 2-way row split: no HBM pad copy,
    #    ghost rows of the partial last tile are masked in-kernel.
    Nr = 13
    out_r = jax.block_until_ready(
        focal_loss(log_probs[:Nr], targets[:Nr], gamma=gamma, pad_idx=pad_idx, tile_n=8))
    ref_r = _focal_loss_ref(log_probs[:Nr], targets[:Nr], gamma=gamma, pad_idx=pad_idx)
    assert jnp.allclose(out_r, ref_r, rtol=1e-5, atol=1e-5), (out_r, ref_r)

    # 4) bf16 log-probs read natively (half the HBM traffic); math is f32 in-kernel.
    lp_bf16 = log_probs.astype(jnp.bfloat16)
    out_b = jax.block_until_ready(focal_loss(lp_bf16, targets, gamma=gamma, pad_idx=pad_idx))
    ref_b = _focal_loss_ref(lp_bf16.astype(jnp.float32), targets, gamma=gamma, pad_idx=pad_idx)
    assert jnp.allclose(out_b, ref_b, rtol=1e-4, atol=1e-4), (out_b, ref_b)

    print("KERNEL_OK")
</pallas_src>

<mosaic_0001>
module attributes {stable_mosaic.version = 11 : i64} {
  func.func @_focal_loss_kernel(%arg0: i32, %arg1: i32, %arg2: memref<16x128xf32, #tpu.memory_space<vmem>>, %arg3: memref<16x1xi32, #tpu.memory_space<vmem>>, %arg4: memref<1x1x1xf32, #tpu.memory_space<vmem>>) attributes {dimension_semantics = [#tpu.dimension_semantics<parallel>, #tpu.dimension_semantics<arbitrary>], iteration_bounds = array<i64: 1, 1>, scalar_prefetch = 0 : i64, scratch_operands = 0 : i64, tpu.core_type = #tpu.core_type<tc>, window_params = [{transform_indices = @transform_0, window_bounds = array<i64: 16, 128>}, {transform_indices = @transform_1, window_bounds = array<i64: 16, 1>}, {transform_indices = @transform_2, window_bounds = array<i64: 1, 1, 1>}]} {
    %c0_i32 = arith.constant 0 : i32
    %0 = arith.cmpi eq, %arg1, %c0_i32 : i32
    %1 = arith.extui %0 : i1 to i32
    %c0_i32_0 = arith.constant 0 : i32
    %2 = arith.cmpi ne, %1, %c0_i32_0 : i32
    scf.if %2 {
      %cst_22 = arith.constant 0.000000e+00 : f32
      %53 = vector.broadcast %cst_22 : f32 to vector<1x1x1xf32>
      %c0_23 = arith.constant 0 : index
      %c0_24 = arith.constant 0 : index
      %c0_25 = arith.constant 0 : index
      %54 = vector.load %arg4[%c0_23, %c0_24, %c0_25] : memref<1x1x1xf32, #tpu.memory_space<vmem>>, vector<1x1x1xf32>
      tpu.vector_store %arg4[%c0_23, %c0_24, %c0_25], %53 {strides = array<i32>} : memref<1x1x1xf32, #tpu.memory_space<vmem>>, vector<1x1x1xf32>,
    } else {
    }
    %c1_i32 = arith.constant 1 : i32
    %3 = arith.muli %arg0, %c1_i32 : i32
    %4 = arith.addi %3, %arg1 : i32
    %c16_i32 = arith.constant 16 : i32
    %5 = arith.muli %4, %c16_i32 : i32
    %6 = tpu.iota {dimensions = array<i32: 1>} : vector<16x128xi32>
    %7 = tpu.iota {dimensions = array<i32: 0>} : vector<16x1xi32>
    %c0 = arith.constant 0 : index
    %c0_1 = arith.constant 0 : index
    %8 = vector.load %arg2[%c0, %c0_1] : memref<16x128xf32, #tpu.memory_space<vmem>>, vector<16x128xf32>
    %c0_2 = arith.constant 0 : index
    %c0_3 = arith.constant 0 : index
    %9 = vector.load %arg3[%c0_2, %c0_3] : memref<16x1xi32, #tpu.memory_space<vmem>>, vector<16x1xi32>
    %10 = vector.broadcast %9 : vector<16x1xi32> to vector<16x128xi32>
    %11 = arith.cmpi eq, %6, %10 : vector<16x128xi32>
    %cst = arith.constant 0.000000e+00 : f32
    %12 = vector.broadcast %cst : f32 to vector<16x128xf32>
    %13 = arith.select %11, %8, %12 : vector<16x128xi1>, vector<16x128xf32>
    %cst_4 = arith.constant dense<0.000000e+00> : vector<16xf32>
    %14 = vector.multi_reduction <add>, %13, %cst_4 [1] : vector<16x128xf32> to vector<16xf32>
    %15 = vector.shape_cast %14 : vector<16xf32> to vector<16x1xf32>
    %cst_5 = arith.constant dense<0xFF800000> : vector<16xf32>
    %16 = vector.multi_reduction <maximumf>, %8, %cst_5 [1] : vector<16x128xf32> to vector<16xf32>
    %17 = vector.shape_cast %16 : vector<16xf32> to vector<16x1xf32>
    %18 = vector.broadcast %17 : vector<16x1xf32> to vector<16x128xf32>
    %19 = arith.subf %8, %18 : vector<16x128xf32>
    %20 = math.exp %19 : vector<16x128xf32>
    %cst_6 = arith.constant dense<0.000000e+00> : vector<16xf32>
    %21 = vector.multi_reduction <add>, %20, %cst_6 [1] : vector<16x128xf32> to vector<16xf32>
    %22 = vector.shape_cast %21 : vector<16xf32> to vector<16x1xf32>
    %23 = math.log %22 : vector<16x1xf32>
    %24 = arith.addf %17, %23 : vector<16x1xf32>
    %25 = arith.subf %24, %15 : vector<16x1xf32>
    %26 = math.exp %15 : vector<16x1xf32>
    %cst_7 = arith.constant 1.000000e+00 : f32
    %27 = vector.broadcast %cst_7 : f32 to vector<16x1xf32>
    %28 = arith.subf %27, %26 : vector<16x1xf32>
    %cst_8 = arith.constant 0.000000e+00 : f32
    %29 = vector.broadcast %cst_8 : f32 to vector<16x1xf32>
    %30 = arith.maximumf %28, %29 : vector<16x1xf32>
    %cst_9 = arith.constant 2.000000e+00 : f32
    %31 = vector.broadcast %cst_9 : f32 to vector<16x1xf32>
    %32 = math.powf %30, %31 : vector<16x1xf32>
    %33 = arith.mulf %25, %32 : vector<16x1xf32>
    %c0_i32_10 = arith.constant 0 : i32
    %34 = arith.addi %5, %c0_i32_10 : i32
    %35 = vector.broadcast %34 : i32 to vector<16x1xi32>
    %36 = arith.addi %35, %7 : vector<16x1xi32>
    %c16_i32_11 = arith.constant 16 : i32
    %37 = vector.broadcast %c16_i32_11 : i32 to vector<16x1xi32>
    %38 = arith.cmpi slt, %36, %37 : vector<16x1xi32>
    %c0_i32_12 = arith.constant 0 : i32
    %39 = vector.broadcast %c0_i32_12 : i32 to vector<16x1xi32>
    %40 = arith.cmpi ne, %9, %39 : vector<16x1xi32>
    %41 = arith.andi %38, %40 : vector<16x1xi1>
    %cst_13 = arith.constant 0.000000e+00 : f32
    %42 = vector.broadcast %cst_13 : f32 to vector<16x1xf32>
    %43 = arith.select %41, %33, %42 : vector<16x1xi1>, vector<16x1xf32>
    %44 = vector.shape_cast %43 : vector<16x1xf32> to vector<1x16x1xf32>
    %cst_14 = arith.constant dense<0.000000e+00> : vector<1xf32>
    %45 = vector.multi_reduction <add>, %44, %cst_14 [1, 2] : vector<1x16x1xf32> to vector<1xf32>
    %46 = vector.shape_cast %45 : vector<1xf32> to vector<1x1x1xf32>
    %47 = vector.extract %46[0, 0, 0] : f32 from vector<1x1x1xf32>
    %cst_15 = arith.constant 0.000000e+00 : f32
    %48 = arith.addf %cst_15, %47 : f32
    %c0_16 = arith.constant 0 : index
    %c0_17 = arith.constant 0 : index
    %c0_18 = arith.constant 0 : index
    %49 = vector.load %arg4[%c0_16, %c0_17, %c0_18] : memref<1x1x1xf32, #tpu.memory_space<vmem>>, vector<1x1x1xf32>
    %50 = vector.broadcast %48 : f32 to vector<1x1x1xf32>
    %51 = arith.addf %49, %50 : vector<1x1x1xf32>
    %c0_19 = arith.constant 0 : index
    %c0_20 = arith.constant 0 : index
    %c0_21 = arith.constant 0 : index
    %52 = vector.load %arg4[%c0_19, %c0_20, %c0_21] : memref<1x1x1xf32, #tpu.memory_space<vmem>>, vector<1x1x1xf32>
    tpu.vector_store %arg4[%c0_19, %c0_20, %c0_21], %51 {strides = array<i32>} : memref<1x1x1xf32, #tpu.memory_space<vmem>>, vector<1x1x1xf32>,
    return
  }
  func.func @transform_0(%arg0: i32, %arg1: i32) -> (i32, i32) {
    %c1_i32 = arith.constant 1 : i32
    %0 = arith.muli %arg0, %c1_i32 : i32
    %1 = arith.addi %0, %arg1 : i32
    %c0_i32 = arith.constant 0 : i32
    %c0_i32_0 = arith.constant 0 : i32
    return %1, %c0_i32 : i32, i32
  }
  func.func @transform_1(%arg0: i32, %arg1: i32) -> (i32, i32) {
    %c1_i32 = arith.constant 1 : i32
    %0 = arith.muli %arg0, %c1_i32 : i32
    %1 = arith.addi %0, %arg1 : i32
    %c0_i32 = arith.constant 0 : i32
    %c0_i32_0 = arith.constant 0 : i32
    return %1, %c0_i32 : i32, i32
  }
  func.func @transform_2(%arg0: i32, %arg1: i32) -> (i32, i32, i32) {
    %c0_i32 = arith.constant 0 : i32
    %c0_i32_0 = arith.constant 0 : i32
    %c0_i32_1 = arith.constant 0 : i32
    return %arg0, %c0_i32, %c0_i32_0 : i32, i32, i32
  }
}

</mosaic_0001>

<bundles_post_ra>
// kernel: tpu_custom_call.1
= control target key start
LH: loop header
LB: loop body
LE: loop exit
PB: predicated region body
PF: predicated region fallthrough
CT: control target
= control target key end

     0   :  { %v222_v2 = vmov 0   ;;  %s270_s0 = inlined_call_operand.vmem [shape: f32[16,128], index: 0, kind: input, shape index: {}]   ;;  %s271_s1 = inlined_call_operand.vmem [shape: s32[16,1], index: 1, kind: input, shape index: {}]   ;;  %s272_s2 = inlined_call_operand.hbm [shape: f32[1,1,1], index: 2, kind: output, shape index: {}]  }
   0x1   :  { %v69_v0 = vld [vmem:[%s270_s0] sm:$0xff]  ;;  %184 = vset.pattern.permute.xlu1 %v222_v2 }
   0x2   :  { %v246_v1 = vld [vmem:[%s271_s1] sm:$0xff]  ;;  %87 = vmax.xlane.f32.xlu0 %v69_v0 }
   0x3   :  { %7 = vsyncpa [#allocation3], 0  ;;  %v70_v3 = vld [vmem:[%s270_s0 + $0x8] sm:$0xff]  ;;  %74 = vperm.xlu1 %184, %v246_v1   ;;  %185 = vset.pattern.permute.xlu0 %v222_v2  ;;  %v64_v5 = vlaneseq  ;;  %vm126_vm2 = vcmp.ne.s32.totalorder %v246_v1, 0  ;;  %vm132_vm4 = vcmask 7168   ;;  %vm60_vm5 = vcmask 0  }
   0x4   :  { %v72_v4 = vld [vmem:[%s271_s1 + $0x8] sm:$0xff]  ;;  %v223_v48 = vmov 0.0   ;;  %s224_s0 = smov [#allocation2]  }
   0x5   :  { %v65_v6 = vand.u32 127, %v64_v5  ;;  %vm127_vm3 = vcmp.ne.s32.totalorder %v72_v4, 0  ;;  %61 = vst.msk [vmem:[#allocation2] sm:$0x1] %vm60_vm5, %v223_v48  ;;  %s157_s1 = sshll.u32 %s224_s0, 4  ;;  %s158_s1 = int_to_ptr.vmem [resolvable:$true] %s157_s1 }
   0x6   :  { %89 = vmax.xlane.f32.xlu0 %v70_v3  ;;  %s198_s18 = scalar_lea.vmem %s158_s1, 16  ;;  %s202_s19 = scalar_lea.vmem %s158_s1, 32 }
   0x7   :  { %77 = vperm.xlu1 %184, %v72_v4   ;;  %p199_p0 = scmp.ne.s32.totalorder %s158_s1, %s198_s18  ;;  %p203_p1 = scmp.lt.s32.totalorder %s158_s1, %s158_s1 }
   0x8   :  { %p204_p2 = scmp.lt.s32.totalorder %s202_s19, %s198_s18 }
   0xa   :  { %p205_p3 = por %p204_p2, %p203_p1 }
   0xc   :  { %v146_v56 = vld [vmem:[#allocation2] sm:$0x1]  ;;  %p206_p4 = pnand %p205_p3, %p199_p0 }
  0x82   :  { %v75_v7 = vpop.permute.xlu1 %74 }
  0x83   :  { %vm79_vm0 = vcmp.eq.s32.totalorder %v65_v6, %v75_v7 }
  0x84   :  { %v81_v8 = vsel %vm79_vm0, %v69_v0, 0.0 }
  0x85   :  { %83 = vadd.xlane.f32.xlu0 %v81_v8 }
  0x86   :  { %v78_v9 = vpop.permute.xlu1 %77 }
  0x87   :  { %vm80_vm1 = vcmp.eq.s32.totalorder %v65_v6, %v78_v9 }
  0x88   :  { %v82_v10 = vsel %vm80_vm1, %v70_v3, 0.0 }
  0x89   :  { %85 = vadd.xlane.f32.xlu1 %v82_v10 }
  0x8f   :  { %v88_v11 = vpop.xlane.xlu0 %87 }
  0x90   :  { %v91_v12 = vsub.f32 %v69_v0, %v88_v11 }
  0x92   :  { %v93_v13 = vmul.f32 1.442695, %v91_v12 }
  0x93   :  { %v90_v14 = vpop.xlane.xlu0 %89 }
  0x94   :  { %186 = vpow2.f32 %v93_v13  ;;  %v92_v15 = vsub.f32 %v70_v3, %v90_v14 }
  0x96   :  { %v95_v16 = vmul.f32 1.442695, %v92_v15 }
  0x98   :  { %188 = vpow2.f32 %v95_v16 }
  0x9e   :  { %v187_v17 = vpop.eup %186 }
  0x9f   :  { %97 = vadd.xlane.f32.xlu0 %v187_v17 }
  0xa2   :  { %v189_v18 = vpop.eup %188 }
  0xa3   :  { %99 = vadd.xlane.f32.xlu0 %v189_v18 }
 0x112   :  { %v84_v19 = vpop.xlane.xlu0 %83 }
 0x113   :  { %v109_v20 = vmul.f32 1.442695, %v84_v19 }
 0x115   :  { %190 = vpow2.f32 %v109_v20 }
 0x116   :  { %v86_v21 = vpop.xlane.xlu1 %85 }
 0x117   :  { %v111_v22 = vmul.f32 1.442695, %v86_v21 }
 0x119   :  { %192 = vpow2.f32 %v111_v22 }
 0x11f   :  { %v191_v25 = vpop.eup %190 }
 0x120   :  { %v113_v26 = vsub.f32 1.0, %v191_v25 }
 0x122   :  { %v115_v30 = vmax.f32 %v113_v26, 0.0 }
 0x123   :  { %v193_v27 = vpop.eup %192 }
 0x124   :  { %v114_v29 = vsub.f32 1.0, %v193_v27  ;;  %v177_v35 = vmul.f32 %v115_v30, %v115_v30 }
 0x126   :  { %v116_v34 = vmax.f32 %v114_v29, 0.0 }
 0x128   :  { %v178_v40 = vmul.f32 %v116_v34, %v116_v34 }
 0x12c   :  { %v98_v23 = vpop.xlane.xlu0 %97 }
 0x12d   :  { %194 = vlog2.f32 %v98_v23 }
 0x130   :  { %v100_v24 = vpop.xlane.xlu0 %99 }
 0x131   :  { %196 = vlog2.f32 %v100_v24 }
 0x137   :  { %v195_v28 = vpop.eup %194 }
 0x138   :  { %v102_v31 = vmul.f32 0.6931472, %v195_v28 }
 0x13a   :  { %v105_v32 = vadd.f32 %v102_v31, %v88_v11 }
 0x13b   :  { %v197_v33 = vpop.eup %196 }
 0x13c   :  { %v107_v36 = vsub.f32 %v105_v32, %v84_v19  ;;  %v104_v37 = vmul.f32 0.6931472, %v197_v33 }
 0x13e   :  { %v106_v38 = vadd.f32 %v104_v37, %v90_v14  ;;  %v119_v39 = vmul.f32 %v177_v35, %v107_v36 }
 0x140   :  { %v108_v41 = vsub.f32 %v106_v38, %v86_v21  ;;  %v130_v43 = vsel %vm126_vm2, %v119_v39, 0.0 }
 0x141   :  { %v133_v45 = vsel %vm132_vm4, %v130_v43, 0.0 }
 0x142   :  { %v120_v42 = vmul.f32 %v178_v40, %v108_v41 }
 0x144   :  { %v131_v44 = vsel %vm127_vm3, %v120_v42, 0.0 }
 0x145   :  { %v134_v46 = vsel %vm132_vm4, %v131_v44, 0.0 }
 0x146   :  { %v135_v47 = vadd.f32 %v134_v46, %v133_v45 }
 0x148   :  { %136 = vadd.xlane.f32.xlu0 %v135_v47 }
 0x1d5   :  { %v137_v49 = vpop.xlane.xlu0 %136 }
 0x1d6   :  { %v138_v50 = vrot.slane %v137_v49, 4 }
 0x1d8   :  { %v139_v51 = vadd.f32 %v138_v50, %v137_v49 }
 0x1da   :  { %v140_v52 = vrot.slane %v139_v51, 2 }
 0x1dc   :  { %v141_v53 = vadd.f32 %v140_v52, %v139_v51 }
 0x1de   :  { %v142_v54 = vrot.slane %v141_v53, 1 }
 0x1e0   :  { %v143_v55 = vadd.f32 %v142_v54, %v141_v53 }
 0x1e2   :  { %179 = vpush %v143_v55 }
 0x213   :  { %s180_s17 = spop %179 }
 0x214   :  { %v147_v57 = vstv %s180_s17 }
 0x215   :  { %v148_v58 = vadd.f32 %v147_v57, %v146_v56 }
 0x217   :  { %150 = vst.msk [vmem:[#allocation2] sm:$0x1] %vm60_vm5, %v148_v58 }
 0x218   :  { %209 = shalt.err (!%p206_p4)
}
 0x219   :  { %s210_s22 = scalar_lea.hbm %s272_s2, 16 }
 0x21a   :  { %p211_p5 = scmp.ne.s32.totalorder %s272_s2, %s210_s22  ;;  %p214_p6 = scmp.lt.u32.totalorder %s210_s22, %s272_s2 }
 0x21c   :  { %p216_p7 = pnand %p214_p6, %p211_p5 }
 0x21e   :  { %219 = shalt.err (!%p216_p7)
}
 0x21f   :  { %160 = dma.vmem_to_hbm [thread:$0]  %s158_s1, 16, %s272_s2, [#allocation3]  }
 0x220   :  { %220 = dma.done.wait [#allocation3], 16  }
 0x221   :  { %221 = vsyncadd [#allocation3], 4294967280 }
 0x222   :  { %164 = vsyncpa [#allocation3], 1 }

</bundles_post_ra>
